<compile_context>
chip_gen: v5e
topology: v5e:2x2
jax: 0.10.0
libtpu: 0.0.40
codegen_flags: <defaults>
</compile_context>

<pallas_src>
import jax
import jax.numpy as jnp
from jax.experimental import pallas as pl
from jax.experimental.pallas import tpu as pltpu

_MIN_GRID_STEPS = 4  # >= 2 steps per TensorCore on v7x (2 TCs)


def _vmem_budgets():
    """Return (vmem_limit_bytes, per-step tile budget) for this chip."""
    phys = 0
    try:
        phys = int(getattr(pltpu.get_tpu_info(), "vmem_capacity_bytes", 0))
    except Exception:
        phys = 0
    if phys >= 96 * 1024 * 1024:  # v5e / v6e: 128 MiB VMEM -> bigger tiles
        return 96 * 1024 * 1024, 36 * 1024 * 1024
    # v7x (64 MiB physical) or unknown: stay conservative.
    return 48 * 1024 * 1024, 20 * 1024 * 1024


def _addcoords2d_kernel(x_ref, coord_ref, o_ref):
    nb, c_in, tw = x_ref.shape
    n_coord = coord_ref.shape[0]
    # Pass-through channels: one big lane-dense copy (the torch.cat payload).
    o_ref[:, :c_in, :] = x_ref[...]
    # Precomputed coordinate plane, broadcast over the batch group.
    o_ref[:, c_in:, :] = jnp.broadcast_to(
        coord_ref[...][None, :, :], (nb, n_coord, tw)).astype(o_ref.dtype)


def _coord_plane_2d(h, w, with_r, dtype):
    """(n_coord, H*W) coordinate plane, same math/order as the PyTorch module.

    Quirky naming preserved: xx_channel varies along H, yy_channel along W.
    """
    xx = (jnp.arange(h, dtype=jnp.float32) / jnp.float32(h - 1)) * 2.0 - 1.0
    yy = (jnp.arange(w, dtype=jnp.float32) / jnp.float32(w - 1)) * 2.0 - 1.0
    xx_plane = jnp.broadcast_to(xx[:, None], (h, w))
    yy_plane = jnp.broadcast_to(yy[None, :], (h, w))
    planes = [xx_plane, yy_plane]
    if with_r:
        planes.append(jnp.sqrt((xx_plane - 0.5) ** 2 + (yy_plane - 0.5) ** 2))
    return jnp.stack(planes, axis=0).reshape(len(planes), h * w).astype(dtype)


def _pick_tiles(n, hw, c, c_out, n_coord, itemsize, budget):
    """Choose (nb, tw, sb): batch group, spatial tile width, #spatial blocks."""
    # Sublane padding of the channel dim: 8 rows (f32) / 16 (bf16) / 32 (int8).
    sub = max(8, 32 // itemsize)
    pad = lambda v: -(-v // sub) * sub
    pc, pco, pnc = pad(c), pad(c_out), pad(n_coord)

    def step_bytes(nb, tw):
        # Double-buffered: input block + output block + coord block.
        return 2 * (nb * (pc + pco) + pnc) * tw * itemsize

    per_tw = 2 * (pc + pco + pnc) * itemsize
    tw_budget = max(128, (budget // per_tw) // 128 * 128)

    if step_bytes(1, hw) <= budget:
        tw = hw  # whole spatial extent per step (legal for any hw)
    else:
        tw = tw_budget  # multiple of 128; edge block is masked if hw % tw != 0
        if hw % 128 == 0:
            # Prefer an exact divisor of hw (no masked edge stores).
            d = tw
            while d >= 128 and hw % d != 0:
                d -= 128
            if d >= 128:
                tw = d
    sb = -(-hw // tw)

    # Batch grouping amortizes per-step pipeline overhead for small images.
    nb = 1
    if sb == 1 and n > 1:
        for d in range(n, 0, -1):
            if n % d == 0 and step_bytes(d, tw) <= budget:
                nb = d
                break

    # Guarantee enough grid steps for megacore sharding + pipelining.
    def total_steps():
        return sb * (n // nb)

    while nb > 1 and total_steps() < _MIN_GRID_STEPS:
        nb -= 1
        while nb > 1 and n % nb != 0:
            nb -= 1

    if total_steps() < _MIN_GRID_STEPS and tw > 128:
        bb = n // nb
        target_sb = -(-_MIN_GRID_STEPS // bb)
        tw2 = max(128, -(-hw // target_sb))
        tw2 = -(-tw2 // 128) * 128
        tw2 = min(tw2, tw)
        if hw % 128 == 0:
            d = tw2
            while d >= 128 and hw % d != 0:
                d -= 128
            if d >= 128:
                tw2 = d
        tw = tw2
        sb = -(-hw // tw)

    return nb, tw, sb


def add_coords_2d(x, with_r: bool = False):
    """AddCoords(rank=2) forward.  x: (N, C, H, W) -> (N, C+2(+1), H, W)."""
    n, c, h, w = x.shape
    n_coord = 3 if with_r else 2
    c_out = c + n_coord
    hw = h * w
    itemsize = jnp.dtype(x.dtype).itemsize

    vmem_limit, budget = _vmem_budgets()
    nb, tw, sb = _pick_tiles(n, hw, c, c_out, n_coord, itemsize, budget)
    bb = n // nb
    # Batch axis innermost: coord block index is constant across consecutive
    # steps, so Pallas elides its re-DMA.
    grid = (sb, bb)

    # Lane-dense view (free metadata reshape) and precomputed coord plane.
    x_flat = x.reshape(n, c, hw)
    coord_plane = _coord_plane_2d(h, w, with_r, x.dtype)

    cost = pl.CostEstimate(
        flops=0,
        transcendentals=0,
        bytes_accessed=int((n * (c + c_out) + n_coord) * hw * itemsize),
    )

    out_flat = pl.pallas_call(
        _addcoords2d_kernel,
        out_shape=jax.ShapeDtypeStruct((n, c_out, hw), x.dtype),
        grid_spec=pltpu.PrefetchScalarGridSpec(
            num_scalar_prefetch=0,
            grid=grid,
            in_specs=[
                pl.BlockSpec((nb, c, tw), lambda s, i: (i, 0, s)),
                pl.BlockSpec((n_coord, tw), lambda s, i: (0, s)),
            ],
            out_specs=pl.BlockSpec((nb, c_out, tw), lambda s, i: (i, 0, s)),
        ),
        compiler_params=pltpu.CompilerParams(
            dimension_semantics=("parallel", "parallel"),
            vmem_limit_bytes=vmem_limit,
        ),
        cost_estimate=cost,
    )(x_flat, coord_plane)

    return out_flat.reshape(n, c_out, h, w)


def _reference_add_coords_2d(x, with_r: bool = False):
    """Pure-JAX reference mirroring the PyTorch semantics exactly."""
    n, c, h, w = x.shape
    xx = (jnp.arange(h, dtype=jnp.float32) / jnp.float32(h - 1)) * 2.0 - 1.0
    yy = (jnp.arange(w, dtype=jnp.float32) / jnp.float32(w - 1)) * 2.0 - 1.0
    xx_ch = jnp.broadcast_to(xx[None, None, :, None], (n, 1, h, w))
    yy_ch = jnp.broadcast_to(yy[None, None, None, :], (n, 1, h, w))
    out = jnp.concatenate([x.astype(jnp.float32), xx_ch, yy_ch], axis=1)
    if with_r:
        rr = jnp.sqrt((xx_ch - 0.5) ** 2 + (yy_ch - 0.5) ** 2)
        out = jnp.concatenate([out, rr], axis=1)
    return out.astype(x.dtype)


if __name__ == "__main__":
    key = jax.random.PRNGKey(0)
    N, C, H, W = 2, 4, 16, 16
    x = jax.random.normal(key, (N, C, H, W), dtype=jnp.float32)

    # with_r = False (module default)
    out = add_coords_2d(x, with_r=False)
    jax.block_until_ready(out)
    ref = _reference_add_coords_2d(x, with_r=False)
    assert out.shape == (N, C + 2, H, W)
    assert jnp.allclose(out, ref, atol=1e-6), "mismatch (with_r=False)"

    # with_r = True
    out_r = add_coords_2d(x, with_r=True)
    jax.block_until_ready(out_r)
    ref_r = _reference_add_coords_2d(x, with_r=True)
    assert out_r.shape == (N, C + 3, H, W)
    assert jnp.allclose(out_r, ref_r, atol=1e-6), "mismatch (with_r=True)"

    # Non-128-multiple spatial extent: exercises the masked edge-block path.
    x2 = jax.random.normal(jax.random.PRNGKey(1), (2, 3, 20, 20),
                           dtype=jnp.float32)
    out2 = add_coords_2d(x2, with_r=False)
    jax.block_until_ready(out2)
    ref2 = _reference_add_coords_2d(x2, with_r=False)
    assert out2.shape == (2, 5, 20, 20)
    assert jnp.allclose(out2, ref2, atol=1e-6), "mismatch (20x20)"

    print("KERNEL_OK")
</pallas_src>

<mosaic_0001>
module attributes {stable_mosaic.version = 11 : i64} {
  func.func @_addcoords2d_kernel(%arg0: i32, %arg1: i32, %arg2: memref<1x4x128xf32, #tpu.memory_space<vmem>>, %arg3: memref<2x128xf32, #tpu.memory_space<vmem>>, %arg4: memref<1x6x128xf32, #tpu.memory_space<vmem>>) attributes {dimension_semantics = [#tpu.dimension_semantics<parallel>, #tpu.dimension_semantics<parallel>], iteration_bounds = array<i64: 2, 2>, scalar_prefetch = 0 : i64, scratch_operands = 0 : i64, tpu.core_type = #tpu.core_type<tc>, window_params = [{transform_indices = @transform_0, window_bounds = array<i64: 1, 4, 128>}, {transform_indices = @transform_1, window_bounds = array<i64: 2, 128>}, {transform_indices = @transform_2, window_bounds = array<i64: 1, 6, 128>}]} {
    %c0 = arith.constant 0 : index
    %c0_0 = arith.constant 0 : index
    %c0_1 = arith.constant 0 : index
    %0 = vector.load %arg2[%c0, %c0_0, %c0_1] : memref<1x4x128xf32, #tpu.memory_space<vmem>>, vector<1x4x128xf32>
    %c0_2 = arith.constant 0 : index
    %c0_3 = arith.constant 0 : index
    %c0_4 = arith.constant 0 : index
    %1 = vector.load %arg4[%c0_2, %c0_3, %c0_4] : memref<1x6x128xf32, #tpu.memory_space<vmem>>, vector<1x4x128xf32>
    tpu.vector_store %arg4[%c0_2, %c0_3, %c0_4], %0 {strides = array<i32>} : memref<1x6x128xf32, #tpu.memory_space<vmem>>, vector<1x4x128xf32>,
    %c0_5 = arith.constant 0 : index
    %c0_6 = arith.constant 0 : index
    %2 = vector.load %arg3[%c0_5, %c0_6] : memref<2x128xf32, #tpu.memory_space<vmem>>, vector<2x128xf32>
    %3 = vector.shape_cast %2 : vector<2x128xf32> to vector<1x2x128xf32>
    %c0_7 = arith.constant 0 : index
    %c4 = arith.constant 4 : index
    %c0_8 = arith.constant 0 : index
    %4 = vector.load %arg4[%c0_7, %c4, %c0_8] : memref<1x6x128xf32, #tpu.memory_space<vmem>>, vector<1x2x128xf32>
    tpu.vector_store %arg4[%c0_7, %c4, %c0_8], %3 {strides = array<i32>} : memref<1x6x128xf32, #tpu.memory_space<vmem>>, vector<1x2x128xf32>,
    return
  }
  func.func @transform_0(%arg0: i32, %arg1: i32) -> (i32, i32, i32) {
    %c0_i32 = arith.constant 0 : i32
    %c0_i32_0 = arith.constant 0 : i32
    return %arg1, %c0_i32, %arg0 : i32, i32, i32
  }
  func.func @transform_1(%arg0: i32, %arg1: i32) -> (i32, i32) {
    %c0_i32 = arith.constant 0 : i32
    %c0_i32_0 = arith.constant 0 : i32
    return %c0_i32, %arg0 : i32, i32
  }
  func.func @transform_2(%arg0: i32, %arg1: i32) -> (i32, i32, i32) {
    %c0_i32 = arith.constant 0 : i32
    %c0_i32_0 = arith.constant 0 : i32
    return %arg1, %c0_i32, %arg0 : i32, i32, i32
  }
}

</mosaic_0001>

<bundles_post_ra>
// kernel: tpu_custom_call.1
= control target key start
LH: loop header
LB: loop body
LE: loop exit
PB: predicated region body
PF: predicated region fallthrough
CT: control target
= control target key end

     0   :  { %s816_s0 = inlined_call_operand.hbm [shape: f32[2,4,256], index: 0, kind: input, shape index: {}]   ;;  %s817_s1 = inlined_call_operand.hbm [shape: f32[2,256], index: 1, kind: input, shape index: {}]   ;;  %s818_s2 = inlined_call_operand.vmem [shape: f32[2,6,256], index: 2, kind: output, shape index: {}]  }
   0x1   :  { %820 = sst [smem:[#allocation9_spill]] %s816_s0 }
   0x2   :  { %7 = vsyncpa [#allocation3], 0 }
   0x3   :  { %9 = vsyncpa [#allocation3 + $0x1], 0 }
   0x4   :  { %10 = vsyncpa [#allocation5], 0 }
   0x5   :  { %12 = vsyncpa [#allocation5 + $0x1], 0  ;;  %s634_s9 = smov 0   ;;  %s636_s10 = smov 0  }
   0x6   :  { %s638_s11 = smov 0   ;;  %s640_s12 = smov 0  }
   0x7   :  { %s642_s13 = smov 0   ;;  %s644_s14 = smov 0  }
   0x8   :  { %s646_s15 = smov 0   ;;  %s648_s16 = smov 0  }
   0x9   :  { %s650_s17 = smov 0   ;;  %s652_s18 = smov 0  }
   0xa   :  { %s654_s19 = smov 0  }
   0xb LB: > { %s347_s20 = sadd.s32 4294967295, %s617_s19   ;;  %s27_s21 = sadd.s32 1, %s609_s17  ;;  %s617_s19 = sphi %s654_s19, %s18_s19   ;;  %s613_s18 = sphi %s652_s18, %s838_s18   ;;  %s609_s17 = sphi %s650_s17, %s837_s17   ;;  %s605_s16 = sphi %s648_s16, %s836_s16   ;;  %s601_s15 = sphi %s646_s15, %s835_s15   ;;  %s597_s14 = sphi %s644_s14, %s834_s14   ;;  %s593_s13 = sphi %s642_s13, %s833_s13   ;;  %s589_s12 = sphi %s640_s12, %s832_s12   ;;  %s585_s11 = sphi %s638_s11, %s831_s11   ;;  %s581_s10 = sphi %s636_s10, %s830_s10   ;;  %s577_s9 = sphi %s634_s9, %s829_s9  }
   0xc   : > { %p28_p0 = scmp.ge.s32.totalorder %s27_s21, 2  ;;  %s30_s22 = sadd.s32 1, %s613_s18 }
   0xd   : > { %s39_s23 = sadd.s32 1, %s597_s14  ;;  %p46_p1 = scmp.ne.s32.totalorder %s597_s14, %s593_s13 }
   0xe   : > { %s840_s21 = smov (%p28_p0, %s27_s21), 0  ;;  %s842_s22 = smov (!%p28_p0, %s30_s22), %s613_s18 }
   0xf   : > { %s34_s24 = ssub.s32 %s609_s17, %s840_s21  ;;  %p47_p2 = scmp.eq.s32.totalorder %s617_s19, 0 }
  0x10   : > { %p32_p3 = scmp.ge.s32.totalorder %s842_s22, 2  ;;  %p52_p4 = scmp.ne.s32.totalorder %s593_s13, %s589_s12 }
  0x11   : > { %p702_p5 = por %p47_p2, %p46_p1  ;;  %p706_p6 = scmp.eq.s32.totalorder %s347_s20, 0 }
  0x12   : > { %s844_s22 = smov (%p32_p3, %s842_s22), 0  ;;  %p374_p8 = scmp.lt.s32.totalorder %s617_s19, 4 }
  0x13   : > { %823 = sst [smem:[#allocation8_spill]] %s844_s22  ;;  %p714_p7 = por %p706_p6, %p52_p4 }
  0x14   : > { %s35_s28 = ssub.s32 %s613_s18, %s844_s22  ;;  %s130_s30 = sand.u32 1, %s597_s14  }
  0x15   : > { %s36_s29 = sor.u32 %s35_s28, %s34_s24  ;;  %p63_p9 = scmp.eq.s32.totalorder %s35_s28, 0 }
  0x16   : > { %p37_p10 = scmp.eq.s32.totalorder %s36_s29, 0  ;;  %s351_s3 = sshll.u32 %s130_s30, 2 }
  0x17   : > { %s352_s5 = sshll.u32 %s609_s17, 1  ;;  %s134_s7 = scalar_lea.vmem [#allocation2], %s351_s3 }
  0x18   : > { %s723_s4 = scalar_select %p37_p10, %s597_s14, %s39_s23  }
  0x19   : > { %s138_s6 = sadd.s32 %s613_s18, %s352_s5  ;;  %s144_s8 = sshll.u32 %s134_s7, 4  ;;  %s145_s8 = int_to_ptr.vmem [resolvable:$true] %s144_s8 }
  0x1a   : > { %s353_s12 = sshll.u32 %s138_s6, 2  ;;  %s825_s0 = sld [smem:[#allocation9_spill]] }
  0x1b   : > { %p368_p11 = pnand %p374_p8, %p702_p5  ;;  %p356_p12 = scmp.ge.s32.totalorder %s617_s19, 1 }
  0x1c   : > { %s131_s3 = scalar_lea.sflag [#allocation3], %s130_s30  ;;  %p168_p13 = scmp.lt.s32.totalorder %s617_s19, 5 }
  0x1d   : > { %s65_s6 = sadd.s32 1, %s585_s11  ;;  %p72_p1 = scmp.ne.s32.totalorder %s585_s11, %s581_s10 }
  0x1e   : > { %p736_p0 = pnand %p356_p12, %p168_p13  ;;  %p78_p4 = scmp.ne.s32.totalorder %s581_s10, %s577_s9 }
  0x1f   : > { %s745_s7 = scalar_select %p63_p9, %s585_s11, %s65_s6  }
  0x20   : > { %s140_s23 = scalar_lea.hbm %s825_s0, %s353_s12  ;;  %p74_p3 = por %p72_p1, %p47_p2 }
  0x21   : > { %s142_s29 = sshll.u32 %s140_s23, 4  ;;  %s151_s25 = sand.u32 1, %s585_s11   ;;  %s143_s29 = int_to_ptr.hbm [resolvable:$true] %s142_s29 }
  0x22   : > { %370 = dma.hbm_to_vmem [thread:$0]  (!%p368_p11), %s143_s29, 64, %s145_s8, %s131_s3  }
  0x23   : > { %s355_s12 = sshll.u32 %s613_s18, 1  ;;  %p755_p5 = por %p78_p4, %p706_p6 }
  0x24   : > { %s354_s8 = sshll.u32 %s151_s25, 1  ;;  %s159_s23 = scalar_lea.hbm %s817_s1, %s355_s12 }
  0x25   : > { %s161_s29 = sshll.u32 %s159_s23, 4  ;;  %s155_s28 = scalar_lea.vmem [#allocation4], %s354_s8  ;;  %s162_s29 = int_to_ptr.hbm [resolvable:$true] %s161_s29 }
  0x26   : > { %s163_s3 = sshll.u32 %s155_s28, 4  ;;  %p371_p2 = pnand %p374_p8, %p74_p3  ;;  %s164_s3 = int_to_ptr.vmem [resolvable:$true] %s163_s3 }
  0x27   : > { %s152_s9 = scalar_lea.sflag [#allocation5], %s151_s25  ;;  %172 = sbr.rel (%p736_p0) target bundleno = 58 (0x3a), region = 28 }
  0x28   : > { %373 = dma.hbm_to_vmem [thread:$0]  (!%p371_p2), %s162_s29, 32, %s164_s3, %s152_s9  }
  0x29   : > { %s174_s26 = sand.u32 (!%p736_p0), 1, %s593_s13  }
  0x2a   : > { %s357_s6 = sshll.u32 (!%p736_p0), %s174_s26, 2  ;;  %s175_s0 = scalar_lea.sflag (!%p736_p0), [#allocation3], %s174_s26 }
  0x2b   : > { %s178_s22 = scalar_lea.vmem (!%p736_p0), [#allocation2], %s357_s6 }
  0x2c   : > { %568 = dma.done.wait (%p714_p7), %s175_s0, 64  }
  0x2d   : > { %570 = vsyncadd (%p714_p7), %s175_s0, 4294967232  ;;  %s184_s12 = sand.u32 1, %s581_s10  }
  0x2e   : > { %s358_s8 = sshll.u32 %s184_s12, 1  ;;  %s185_s25 = scalar_lea.sflag [#allocation5], %s184_s12 }
  0x2f   : > { %s188_s20 = scalar_lea.vmem [#allocation4], %s358_s8 }
  0x30   : > { %572 = dma.done.wait (%p755_p5), %s185_s25, 32  }
  0x31   : > { %574 = vsyncadd (%p755_p5), %s185_s25, 4294967264  ;;  %p218_p6 = scmp.lt.s32.totalorder %s601_s15, 1  ;;  %p220_p8 = scmp.lt.s32.totalorder %s605_s16, 1  ;;  %v226_v0 = vld [vmem:[%s178_s22] sm:$0xf] }
  0x32   : > { %v228_v1 = vld [vmem:[%s188_s20] sm:$0x3] }
  0x33   : > { %s846_s15 = smov (!%p218_p6, %s601_s15), 1  ;;  %s848_s16 = smov (!%p220_p8, %s605_s16), 1 }
  0x34   : > { %s359_s0 = sshll.u32 %s846_s15, 1 }
  0x35   : > { %s223_s27 = sadd.s32 %s359_s0, %s848_s16 }
  0x36   : > { %s360_s5 = sshll.u32 %s223_s27, 3 }
  0x37   : > { %s225_s29 = scalar_lea.vmem %s818_s2, %s360_s5 }
  0x38   : > { %227 = vst [vmem:[%s225_s29] sm:$0xf] %v226_v0 }
  0x39   : > { %229 = vst [vmem:[%s225_s29 + $0x4] sm:$0x3] %v228_v1 }
  0x3a PF: > { %s18_s19 = sadd.s32 1, %s617_s19   ;;  %s828_s30 = sld [smem:[#allocation8_spill]] }
  0x3b   : > { %p15_p7 = scmp.ge.s32.totalorder %s18_s19, 6   ;;  %s829_s9 = smov %s581_s10 }
  0x3c   : > { %s830_s10 = smov %s585_s11  ;;  %s831_s11 = smov %s745_s7 }
  0x3d   : > { %s832_s12 = smov %s593_s13  ;;  %s833_s13 = smov %s597_s14 }
  0x3e   : > { %s834_s14 = smov %s723_s4  ;;  %s835_s15 = smov %s609_s17 }
  0x3f   : > { %s836_s16 = smov %s613_s18  ;;  %s837_s17 = smov %s840_s21 }
  0x40   : > { %s838_s18 = smov %s828_s30  ;;  %17 = sbr.rel (!%p15_p7) target bundleno = 11 (0xb), region = 81 }
  0x45   :  { %257 = vsyncpa [#allocation3], 1 }
  0x46   :  { %259 = vsyncpa [#allocation3 + $0x1], 1 }
  0x47   :  { %260 = vsyncpa [#allocation5], 1 }
  0x48   :  { %262 = vsyncpa [#allocation5 + $0x1], 1 }

</bundles_post_ra>
